<compile_context>
chip_gen: v5e
topology: v5e:2x2
jax: 0.10.0
libtpu: 0.0.40
codegen_flags: <defaults>
</compile_context>

<pallas_src>
import functools

import jax
import jax.numpy as jnp
from jax.experimental import pallas as pl
from jax.experimental.pallas import tpu as pltpu

LANE = 128     # TPU lane width (last dim)
SUBLANE = 8    # f32 sublane tile (second-to-last dim)


def _round_up(x, m):
    return (x + m - 1) // m * m


# ----------------------------- Pallas kernel ------------------------------ #
def _fused_gcn_kernel(*refs, n_conv_layers, compute_dtype):
    # refs = (a_ref, x_ref, w0, b0, w1, b1, ..., out_ref)
    a_ref, x_ref = refs[0], refs[1]
    o_ref = refs[-1]
    wb_refs = refs[2:-1]
    assert len(wb_refs) == 2 * n_conv_layers

    a = a_ref[...].astype(compute_dtype)      # Â stays resident for all layers
    h = x_ref[...].astype(compute_dtype)

    hf = None
    for i in range(n_conv_layers):
        w = wb_refs[2 * i][...].astype(compute_dtype)
        b = wb_refs[2 * i + 1][...]           # bias / epilogue stay in f32
        in_f, out_f = w.shape                 # padded dims == what the MXU runs
        if in_f <= out_f:
            # Aggregate first: (Â @ H) @ W  (cheaper when fan-in is narrower).
            t = jnp.dot(a, h, preferred_element_type=jnp.float32)
            hf = jnp.dot(t.astype(compute_dtype), w,
                         preferred_element_type=jnp.float32) + b
        else:
            # Transform first: Â @ (H @ W).
            t = jnp.dot(h, w, preferred_element_type=jnp.float32)
            hf = jnp.dot(a, t.astype(compute_dtype),
                         preferred_element_type=jnp.float32) + b
        if i < n_conv_layers - 1:
            hf = jnp.maximum(hf, 0.0)         # ReLU between layers (f32)
        h = hf.astype(compute_dtype)          # feed next layer's MXU ops

    o_ref[...] = hf.astype(o_ref.dtype)


# ------------------------------ JAX glue ---------------------------------- #
@functools.partial(jax.jit, static_argnames=("compute_dtype",))
def decoder_forward(a_norm, features, params, *, compute_dtype=jnp.float32):
    """Decoder.forward(features): full GCN stack fused into ONE pallas_call."""
    n, in_feats = features.shape
    n_out = params[-1][0].shape[1]
    n_conv_layers = len(params)

    # Pad N to a lane multiple (Â's last dim and the contraction dim of Â@H)
    # and every feature width to a lane multiple -> lane-dense tiles everywhere.
    n_pad = _round_up(max(n, SUBLANE), LANE)
    in_pad = _round_up(in_feats, LANE)

    a_pad = jnp.zeros((n_pad, n_pad), jnp.float32).at[:n, :n].set(a_norm)
    x_pad = jnp.zeros((n_pad, in_pad), jnp.float32).at[:n, :in_feats].set(features)

    flat_inputs = [a_pad.astype(compute_dtype), x_pad.astype(compute_dtype)]
    prev_pad = in_pad
    for w, b in params:
        in_f, out_f = w.shape
        out_pad = _round_up(out_f, LANE)
        w_pad = jnp.zeros((prev_pad, out_pad), jnp.float32).at[:in_f, :out_f].set(w)
        b_pad = jnp.zeros((1, out_pad), jnp.float32).at[:, :out_f].set(
            b.reshape(1, -1))
        flat_inputs.append(w_pad.astype(compute_dtype))
        flat_inputs.append(b_pad)             # bias kept in f32 (f32 epilogue)
        prev_pad = out_pad

    kernel = functools.partial(
        _fused_gcn_kernel,
        n_conv_layers=n_conv_layers,
        compute_dtype=compute_dtype,
    )

    # VMEM footprint: all resident inputs + output + headroom for intermediates.
    resident_bytes = sum(int(x.size) * x.dtype.itemsize for x in flat_inputs)
    resident_bytes += n_pad * prev_pad * 4
    vmem_limit = int(min(max(3 * resident_bytes + (4 << 20), 16 << 20), 64 << 20))

    vmem_spec = pl.BlockSpec(memory_space=pltpu.MemorySpace.VMEM)
    out = pl.pallas_call(
        kernel,
        out_shape=jax.ShapeDtypeStruct((n_pad, prev_pad), jnp.float32),
        in_specs=[vmem_spec] * len(flat_inputs),
        out_specs=vmem_spec,
        compiler_params=pltpu.CompilerParams(vmem_limit_bytes=vmem_limit),
    )(*flat_inputs)

    return out[:n, :n_out]


def init_decoder_params(key, in_feats, n_hidden, n_layers):
    """Deterministic Glorot-uniform weights + zero biases for the GCN stack."""
    dims = [in_feats] + [n_hidden] * n_layers + [n_hidden]
    params = []
    for i in range(len(dims) - 1):
        key, kw = jax.random.split(key)
        fan_in, fan_out = dims[i], dims[i + 1]
        limit = (6.0 / (fan_in + fan_out)) ** 0.5
        w = jax.random.uniform(kw, (fan_in, fan_out), jnp.float32, -limit, limit)
        b = jnp.zeros((1, fan_out), jnp.float32)
        params.append((w, b))
    return params


def normalize_adjacency(adj):
    """Symmetric normalization Â = D^{-1/2} A D^{-1/2} (DGL GraphConv norm='both')."""
    deg = adj.sum(axis=1)
    d_inv_sqrt = jnp.where(deg > 0, 1.0 / jnp.sqrt(deg), 0.0)
    return adj * d_inv_sqrt[:, None] * d_inv_sqrt[None, :]


def reference_forward(a_norm, features, params):
    h = features
    n_total = len(params)
    for i, (w, b) in enumerate(params):
        h = a_norm @ (h @ w) + b
        if i < n_total - 1:
            h = jnp.maximum(h, 0.0)
    return h


# ------------------------------- Driver ------------------------------------ #
if __name__ == "__main__":
    N = 16          # number of graph nodes
    IN_FEATS = 8
    N_HIDDEN = 32
    N_LAYERS = 2    # -> 3 GraphConv layers total

    key = jax.random.PRNGKey(0)
    k_adj, k_feat, k_par = jax.random.split(key, 3)

    # Deterministic symmetric graph with self-loops.
    rand = jax.random.uniform(k_adj, (N, N))
    adj = (rand + rand.T > 1.2).astype(jnp.float32)
    adj = jnp.maximum(adj, jnp.eye(N, dtype=jnp.float32))
    a_norm = normalize_adjacency(adj)

    features = jax.random.normal(k_feat, (N, IN_FEATS), jnp.float32)
    params = init_decoder_params(k_par, IN_FEATS, N_HIDDEN, N_LAYERS)

    ref = reference_forward(a_norm, features, params)

    # f32 path (exact check).
    out = jax.block_until_ready(decoder_forward(a_norm, features, params))
    assert out.shape == (N, N_HIDDEN), out.shape
    assert jnp.allclose(out, ref, atol=1e-4, rtol=1e-4), "mismatch vs JAX reference"

    # bf16 MXU path (v6e/v7x): bf16 operands, f32 accumulation + f32 epilogue.
    out_bf16 = jax.block_until_ready(
        decoder_forward(a_norm, features, params, compute_dtype=jnp.bfloat16))
    err = float(jnp.max(jnp.abs(out_bf16 - ref)))
    assert err < 0.5, f"bf16 path numerically off: max abs err {err}"

    print("KERNEL_OK")
</pallas_src>

<mosaic_0001>
module attributes {stable_mosaic.version = 11 : i64} {
  func.func @_fused_gcn_kernel(%arg0: memref<128x128xf32, #tpu.memory_space<vmem>>, %arg1: memref<128x128xf32, #tpu.memory_space<vmem>>, %arg2: memref<128x128xf32, #tpu.memory_space<vmem>>, %arg3: memref<1x128xf32, #tpu.memory_space<vmem>>, %arg4: memref<128x128xf32, #tpu.memory_space<vmem>>, %arg5: memref<1x128xf32, #tpu.memory_space<vmem>>, %arg6: memref<128x128xf32, #tpu.memory_space<vmem>>, %arg7: memref<1x128xf32, #tpu.memory_space<vmem>>, %arg8: memref<128x128xf32, #tpu.memory_space<vmem>>) attributes {dimension_semantics = [], scalar_prefetch = 0 : i64, scratch_operands = 0 : i64, tpu.core_type = #tpu.core_type<tc>} {
    %c0 = arith.constant 0 : index
    %c0_0 = arith.constant 0 : index
    %0 = vector.load %arg0[%c0, %c0_0] : memref<128x128xf32, #tpu.memory_space<vmem>>, vector<128x128xf32>
    %c0_1 = arith.constant 0 : index
    %c0_2 = arith.constant 0 : index
    %1 = vector.load %arg1[%c0_1, %c0_2] : memref<128x128xf32, #tpu.memory_space<vmem>>, vector<128x128xf32>
    %c0_3 = arith.constant 0 : index
    %c0_4 = arith.constant 0 : index
    %2 = vector.load %arg2[%c0_3, %c0_4] : memref<128x128xf32, #tpu.memory_space<vmem>>, vector<128x128xf32>
    %c0_5 = arith.constant 0 : index
    %c0_6 = arith.constant 0 : index
    %3 = vector.load %arg3[%c0_5, %c0_6] : memref<1x128xf32, #tpu.memory_space<vmem>>, vector<1x128xf32>
    %cst = arith.constant dense<0.000000e+00> : vector<128x128xf32>
    %4 = tpu.matmul %0, %1, %cst {dimension_numbers = #tpu.dot_dimension_numbers<[1], [0], [0], [1], [0, 0, 1, 1], [], []>} : vector<128x128xf32>, vector<128x128xf32>, vector<128x128xf32> -> vector<128x128xf32>
    %cst_7 = arith.constant dense<0.000000e+00> : vector<128x128xf32>
    %5 = tpu.matmul %4, %2, %cst_7 {dimension_numbers = #tpu.dot_dimension_numbers<[1], [0], [0], [1], [0, 0, 1, 1], [], []>} : vector<128x128xf32>, vector<128x128xf32>, vector<128x128xf32> -> vector<128x128xf32>
    %6 = vector.broadcast %3 : vector<1x128xf32> to vector<128x128xf32>
    %7 = arith.addf %5, %6 : vector<128x128xf32>
    %cst_8 = arith.constant 0.000000e+00 : f32
    %8 = vector.broadcast %cst_8 : f32 to vector<128x128xf32>
    %9 = arith.maximumf %7, %8 : vector<128x128xf32>
    %c0_9 = arith.constant 0 : index
    %c0_10 = arith.constant 0 : index
    %10 = vector.load %arg4[%c0_9, %c0_10] : memref<128x128xf32, #tpu.memory_space<vmem>>, vector<128x128xf32>
    %c0_11 = arith.constant 0 : index
    %c0_12 = arith.constant 0 : index
    %11 = vector.load %arg5[%c0_11, %c0_12] : memref<1x128xf32, #tpu.memory_space<vmem>>, vector<1x128xf32>
    %cst_13 = arith.constant dense<0.000000e+00> : vector<128x128xf32>
    %12 = tpu.matmul %0, %9, %cst_13 {dimension_numbers = #tpu.dot_dimension_numbers<[1], [0], [0], [1], [0, 0, 1, 1], [], []>} : vector<128x128xf32>, vector<128x128xf32>, vector<128x128xf32> -> vector<128x128xf32>
    %cst_14 = arith.constant dense<0.000000e+00> : vector<128x128xf32>
    %13 = tpu.matmul %12, %10, %cst_14 {dimension_numbers = #tpu.dot_dimension_numbers<[1], [0], [0], [1], [0, 0, 1, 1], [], []>} : vector<128x128xf32>, vector<128x128xf32>, vector<128x128xf32> -> vector<128x128xf32>
    %14 = vector.broadcast %11 : vector<1x128xf32> to vector<128x128xf32>
    %15 = arith.addf %13, %14 : vector<128x128xf32>
    %cst_15 = arith.constant 0.000000e+00 : f32
    %16 = vector.broadcast %cst_15 : f32 to vector<128x128xf32>
    %17 = arith.maximumf %15, %16 : vector<128x128xf32>
    %c0_16 = arith.constant 0 : index
    %c0_17 = arith.constant 0 : index
    %18 = vector.load %arg6[%c0_16, %c0_17] : memref<128x128xf32, #tpu.memory_space<vmem>>, vector<128x128xf32>
    %c0_18 = arith.constant 0 : index
    %c0_19 = arith.constant 0 : index
    %19 = vector.load %arg7[%c0_18, %c0_19] : memref<1x128xf32, #tpu.memory_space<vmem>>, vector<1x128xf32>
    %cst_20 = arith.constant dense<0.000000e+00> : vector<128x128xf32>
    %20 = tpu.matmul %0, %17, %cst_20 {dimension_numbers = #tpu.dot_dimension_numbers<[1], [0], [0], [1], [0, 0, 1, 1], [], []>} : vector<128x128xf32>, vector<128x128xf32>, vector<128x128xf32> -> vector<128x128xf32>
    %cst_21 = arith.constant dense<0.000000e+00> : vector<128x128xf32>
    %21 = tpu.matmul %20, %18, %cst_21 {dimension_numbers = #tpu.dot_dimension_numbers<[1], [0], [0], [1], [0, 0, 1, 1], [], []>} : vector<128x128xf32>, vector<128x128xf32>, vector<128x128xf32> -> vector<128x128xf32>
    %22 = vector.broadcast %19 : vector<1x128xf32> to vector<128x128xf32>
    %23 = arith.addf %21, %22 : vector<128x128xf32>
    %c0_22 = arith.constant 0 : index
    %c0_23 = arith.constant 0 : index
    %24 = vector.load %arg8[%c0_22, %c0_23] : memref<128x128xf32, #tpu.memory_space<vmem>>, vector<128x128xf32>
    tpu.vector_store %arg8[%c0_22, %c0_23], %23 {strides = array<i32>} : memref<128x128xf32, #tpu.memory_space<vmem>>, vector<128x128xf32>,
    return
  }
}

</mosaic_0001>

<bundles_post_ra>
// kernel: decoder_forward.1
= control target key start
LH: loop header
LB: loop body
LE: loop exit
PB: predicated region body
PF: predicated region fallthrough
CT: control target
= control target key end

     0   :  { %s1020_s1 = inlined_call_operand.vmem [shape: f32[128,128], index: 1, kind: input, shape index: {}]   ;;  %s1021_s0 = inlined_call_operand.vmem [shape: f32[128,128], index: 0, kind: input, shape index: {}]   ;;  %s1022_s2 = inlined_call_operand.vmem [shape: f32[128,128], index: 2, kind: input, shape index: {}]   ;;  %s1023_s3 = inlined_call_operand.vmem [shape: f32[1,128], index: 3, kind: input, shape index: {}]   ;;  %s1024_s4 = inlined_call_operand.vmem [shape: f32[128,128], index: 4, kind: input, shape index: {}]   ;;  %s1025_s5 = inlined_call_operand.vmem [shape: f32[1,128], index: 5, kind: input, shape index: {}]   ;;  %s1026_s6 = inlined_call_operand.vmem [shape: f32[128,128], index: 6, kind: input, shape index: {}]   ;;  %s1027_s7 = inlined_call_operand.vmem [shape: f32[1,128], index: 7, kind: input, shape index: {}]   ;;  %s1028_s8 = inlined_call_operand.vmem [shape: f32[128,128], index: 8, kind: output, shape index: {}]  }
   0x1   :  { %v60_v0 = vld [vmem:[%s1020_s1 + $0x78] sm:$0xff]  ;;  %v59_v1 = vld [vmem:[%s1020_s1 + $0x70] sm:$0xff]  ;;  %v58_v2 = vld [vmem:[%s1020_s1 + $0x68] sm:$0xff] }
   0x2   :  { %563 = vmatpush.msra.mxu2 %v60_v0  ;;  %78 = vmatpush.msra.mxu0 %v60_v0  ;;  %v57_v3 = vld [vmem:[%s1020_s1 + $0x60] sm:$0xff]  ;;  %v56_v4 = vld [vmem:[%s1020_s1 + $0x58] sm:$0xff]  ;;  %v55_v5 = vld [vmem:[%s1020_s1 + $0x50] sm:$0xff] }
   0x3   :  { %v54_v6 = vld [vmem:[%s1020_s1 + $0x48] sm:$0xff]  ;;  %v53_v7 = vld [vmem:[%s1020_s1 + $0x40] sm:$0xff]  ;;  %v52_v8 = vld [vmem:[%s1020_s1 + $0x38] sm:$0xff] }
   0x4   :  { %564 = vmatpush.msra.mxu2 %v59_v1  ;;  %79 = vmatpush.msra.mxu0 %v59_v1  ;;  %v51_v9 = vld [vmem:[%s1020_s1 + $0x30] sm:$0xff]  ;;  %v50_v10 = vld [vmem:[%s1020_s1 + $0x28] sm:$0xff]  ;;  %v49_v11 = vld [vmem:[%s1020_s1 + $0x20] sm:$0xff] }
   0x5   :  { %v48_v12 = vld [vmem:[%s1020_s1 + $0x18] sm:$0xff]  ;;  %v47_v13 = vld [vmem:[%s1020_s1 + $0x10] sm:$0xff]  ;;  %v46_v14 = vld [vmem:[%s1020_s1 + $0x8] sm:$0xff] }
   0x6   :  { %565 = vmatpush.msra.mxu2 %v58_v2  ;;  %80 = vmatpush.msra.mxu0 %v58_v2  ;;  %v45_v15 = vld [vmem:[%s1020_s1] sm:$0xff]  ;;  %v706_v18 = vld [vmem:[%s1021_s0 + $0x48] sm:$0xff]  ;;  %v718_v20 = vld [vmem:[%s1021_s0 + $0x50] sm:$0xff] }
   0x7   :  { %v694_v16 = vld [vmem:[%s1021_s0 + $0x40] sm:$0xff]  ;;  %v711_v19 = vld [vmem:[%s1021_s0 + $0x8] sm:$0xff]  ;;  %v723_v21 = vld [vmem:[%s1021_s0 + $0x10] sm:$0xff] }
   0x8   :  { %566 = vmatpush.msra.mxu2 %v57_v3  ;;  %81 = vmatpush.msra.mxu0 %v57_v3  ;;  %v699_v17 = vld [vmem:[%s1021_s0] sm:$0xff]  ;;  %v730_v22 = vld [vmem:[%s1021_s0 + $0x58] sm:$0xff]  ;;  %v75_v25 = vld [vmem:[%s1022_s2 + $0x70] sm:$0xff] }
   0x9   :  { %v735_v23 = vld [vmem:[%s1021_s0 + $0x18] sm:$0xff]  ;;  %v74_v26 = vld [vmem:[%s1022_s2 + $0x68] sm:$0xff]  ;;  %v751_v27 = vld [vmem:[%s1021_s0 + $0x60] sm:$0xff] }
   0xa   :  { %567 = vmatpush.msra.mxu2 %v56_v4  ;;  %82 = vmatpush.msra.mxu0 %v56_v4  ;;  %v76_v24 = vld [vmem:[%s1022_s2 + $0x78] sm:$0xff]  ;;  %v756_v28 = vld [vmem:[%s1021_s0 + $0x20] sm:$0xff]  ;;  %v71_v31 = vld [vmem:[%s1022_s2 + $0x50] sm:$0xff] }
   0xb   :  { %579 = vmatpush.msra.mxu3 %v76_v24  ;;  %146 = vmatpush.msra.mxu1 %v76_v24  ;;  %v73_v29 = vld [vmem:[%s1022_s2 + $0x60] sm:$0xff]  ;;  %v72_v30 = vld [vmem:[%s1022_s2 + $0x58] sm:$0xff]  ;;  %v70_v32 = vld [vmem:[%s1022_s2 + $0x48] sm:$0xff] }
   0xc   :  { %568 = vmatpush.msra.mxu2 %v55_v5  ;;  %83 = vmatpush.msra.mxu0 %v55_v5  ;;  %v775_v33 = vld [vmem:[%s1021_s0 + $0x68] sm:$0xff]  ;;  %v69_v35 = vld [vmem:[%s1022_s2 + $0x40] sm:$0xff]  ;;  %v68_v36 = vld [vmem:[%s1022_s2 + $0x38] sm:$0xff] }
   0xd   :  { %580 = vmatpush.msra.mxu3 %v75_v25  ;;  %147 = vmatpush.msra.mxu1 %v75_v25  ;;  %v780_v34 = vld [vmem:[%s1021_s0 + $0x28] sm:$0xff]  ;;  %v67_v37 = vld [vmem:[%s1022_s2 + $0x30] sm:$0xff]  ;;  %v65_v41 = vld [vmem:[%s1022_s2 + $0x20] sm:$0xff] }
   0xe   :  { %569 = vmatpush.msra.mxu2 %v54_v6  ;;  %84 = vmatpush.msra.mxu0 %v54_v6  ;;  %v66_v38 = vld [vmem:[%s1022_s2 + $0x28] sm:$0xff]  ;;  %v799_v39 = vld [vmem:[%s1021_s0 + $0x70] sm:$0xff]  ;;  %v64_v42 = vld [vmem:[%s1022_s2 + $0x18] sm:$0xff] }
   0xf   :  { %581 = vmatpush.msra.mxu3 %v74_v26  ;;  %148 = vmatpush.msra.mxu1 %v74_v26  ;;  %v804_v40 = vld [vmem:[%s1021_s0 + $0x30] sm:$0xff]  ;;  %v62_v44 = vld [vmem:[%s1022_s2 + $0x8] sm:$0xff]  ;;  %v823_v45 = vld [vmem:[%s1021_s0 + $0x78] sm:$0xff] }
  0x10   :  { %570 = vmatpush.msra.mxu2 %v53_v7  ;;  %85 = vmatpush.msra.mxu0 %v53_v7  ;;  %v63_v43 = vld [vmem:[%s1022_s2 + $0x10] sm:$0xff]  ;;  %v828_v46 = vld [vmem:[%s1021_s0 + $0x38] sm:$0xff]  ;;  %v61_v47 = vld [vmem:[%s1022_s2] sm:$0xff] }
  0x11   :  { %582 = vmatpush.msra.mxu3 %v73_v29  ;;  %149 = vmatpush.msra.mxu1 %v73_v29 }
  0x12   :  { %571 = vmatpush.msra.mxu2 %v52_v8  ;;  %86 = vmatpush.msra.mxu0 %v52_v8 }
  0x13   :  { %583 = vmatpush.msra.mxu3 %v72_v30  ;;  %150 = vmatpush.msra.mxu1 %v72_v30 }
  0x14   :  { %572 = vmatpush.msra.mxu2 %v51_v9  ;;  %87 = vmatpush.msra.mxu0 %v51_v9 }
  0x15   :  { %584 = vmatpush.msra.mxu3 %v71_v31  ;;  %151 = vmatpush.msra.mxu1 %v71_v31 }
  0x16   :  { %573 = vmatpush.msra.mxu2 %v50_v10  ;;  %88 = vmatpush.msra.mxu0 %v50_v10 }
  0x17   :  { %585 = vmatpush.msra.mxu3 %v70_v32  ;;  %152 = vmatpush.msra.mxu1 %v70_v32 }
  0x18   :  { %574 = vmatpush.msra.mxu2 %v49_v11  ;;  %89 = vmatpush.msra.mxu0 %v49_v11 }
  0x19   :  { %586 = vmatpush.msra.mxu3 %v69_v35  ;;  %153 = vmatpush.msra.mxu1 %v69_v35 }
  0x1a   :  { %575 = vmatpush.msra.mxu2 %v48_v12  ;;  %90 = vmatpush.msra.mxu0 %v48_v12 }
  0x1b   :  { %587 = vmatpush.msra.mxu3 %v68_v36  ;;  %154 = vmatpush.msra.mxu1 %v68_v36 }
  0x1c   :  { %576 = vmatpush.msra.mxu2 %v47_v13  ;;  %91 = vmatpush.msra.mxu0 %v47_v13  ;;  %v595_v13 = vld [vmem:[%s1023_s3] ss:$0 sm:$0xff] }
  0x1d   :  { %588 = vmatpush.msra.mxu3 %v67_v37  ;;  %155 = vmatpush.msra.mxu1 %v67_v37 }
  0x1e   :  { %577 = vmatpush.msra.mxu2 %v46_v14  ;;  %92 = vmatpush.msra.mxu0 %v46_v14 }
  0x1f   :  { %589 = vmatpush.msra.mxu3 %v66_v38  ;;  %156 = vmatpush.msra.mxu1 %v66_v38 }
  0x20   :  { %578 = vmatpush.msra.mxu2 %v45_v15  ;;  %93 = vmatpush.msra.mxu0 %v45_v15 }
  0x21   :  { %118 = vmatmul.f32.vlgmr.msra.gmra.mxu2 %v694_v16  ;;  %94 = vmatmul.f32.vlgmr.msra.gmra.mxu0 %v699_v17 }
  0x22   :  { %590 = vmatpush.msra.mxu3 %v65_v41  ;;  %157 = vmatpush.msra.mxu1 %v65_v41 }
  0x24   :  { %591 = vmatpush.msra.mxu3 %v64_v42  ;;  %158 = vmatpush.msra.mxu1 %v64_v42 }
  0x26   :  { %592 = vmatpush.msra.mxu3 %v63_v43  ;;  %159 = vmatpush.msra.mxu1 %v63_v43 }
  0x28   :  { %593 = vmatpush.msra.mxu3 %v62_v44  ;;  %160 = vmatpush.msra.mxu1 %v62_v44 }
  0x29   :  { %121 = vmatmul.f32.gmra.mxu2 %v706_v18  ;;  %97 = vmatmul.f32.gmra.mxu0 %v711_v19 }
  0x2a   :  { %594 = vmatpush.msra.mxu3 %v61_v47  ;;  %161 = vmatpush.msra.mxu1 %v61_v47 }
  0x31   :  { %124 = vmatmul.f32.gmra.mxu2 %v718_v20  ;;  %100 = vmatmul.f32.gmra.mxu0 %v723_v21 }
  0x39   :  { %127 = vmatmul.f32.gmra.mxu2 %v730_v22  ;;  %103 = vmatmul.f32.gmra.mxu0 %v735_v23 }
  0x41   :  { %130 = vmatmul.f32.gmra.mxu2 %v751_v27  ;;  %106 = vmatmul.f32.gmra.mxu0 %v756_v28 }
  0x49   :  { %133 = vmatmul.f32.gmra.mxu2 %v775_v33  ;;  %109 = vmatmul.f32.gmra.mxu0 %v780_v34 }
  0x51   :  { %136 = vmatmul.f32.gmra.mxu2 %v799_v39  ;;  %112 = vmatmul.f32.gmra.mxu0 %v804_v40 }
  0x59   :  { %139 = vmatmul.f32.gmra.mxu2 %v823_v45  ;;  %115 = vmatmul.f32.gmra.mxu0 %v828_v46 }
  0x9e   :  { %v95_v48 = vpop.f32.mrf.mxu0 }
  0x9f   :  { %162 = vmatmul.f32.vlgmr.msra.gmra.mxu1 %v95_v48 }
  0xa4   :  { %v119_v49 = vpop.f32.mrf.mxu2 }
  0xa5   :  { %186 = vmatmul.f32.vlgmr.msra.gmra.mxu3 %v119_v49 }
  0xa6   :  { %v98_v50 = vpop.f32.mrf.mxu0 }
  0xa7   :  { %165 = vmatmul.f32.gmra.mxu1 %v98_v50 }
  0xac   :  { %v122_v51 = vpop.f32.mrf.mxu2 }
  0xad   :  { %189 = vmatmul.f32.gmra.mxu3 %v122_v51 }
  0xae   :  { %v101_v52 = vpop.f32.mrf.mxu0 }
  0xaf   :  { %168 = vmatmul.f32.gmra.mxu1 %v101_v52 }
  0xb4   :  { %v125_v53 = vpop.f32.mrf.mxu2 }
  0xb5   :  { %192 = vmatmul.f32.gmra.mxu3 %v125_v53 }
  0xb6   :  { %v104_v54 = vpop.f32.mrf.mxu0 }
  0xb7   :  { %171 = vmatmul.f32.gmra.mxu1 %v104_v54 }
  0xbc   :  { %v128_v55 = vpop.f32.mrf.mxu2 }
  0xbd   :  { %195 = vmatmul.f32.gmra.mxu3 %v128_v55 }
  0xbe   :  { %v107_v56 = vpop.f32.mrf.mxu0 }
  0xbf   :  { %174 = vmatmul.f32.gmra.mxu1 %v107_v56 }
  0xc4   :  { %v131_v57 = vpop.f32.mrf.mxu2 }
  0xc5   :  { %198 = vmatmul.f32.gmra.mxu3 %v131_v57 }
  0xc6   :  { %v110_v58 = vpop.f32.mrf.mxu0 }
  0xc7   :  { %177 = vmatmul.f32.gmra.mxu1 %v110_v58 }
  0xcc   :  { %v134_v59 = vpop.f32.mrf.mxu2 }
  0xcd   :  { %201 = vmatmul.f32.gmra.mxu3 %v134_v59 }
  0xce   :  { %v113_v60 = vpop.f32.mrf.mxu0 }
  0xcf   :  { %180 = vmatmul.f32.gmra.mxu1 %v113_v60 }
  0xd4   :  { %v137_v61 = vpop.f32.mrf.mxu2 }
  0xd5   :  { %204 = vmatmul.f32.gmra.mxu3 %v137_v61 }
  0xd6   :  { %v116_v62 = vpop.f32.mrf.mxu0 }
  0xd7   :  { %183 = vmatmul.f32.gmra.mxu1 %v116_v62 }
  0xdc   :  { %v140_v63 = vpop.f32.mrf.mxu2 }
  0xdd   :  { %207 = vmatmul.f32.gmra.mxu3 %v140_v63 }
 0x11c   :  { %v163_v0 = vpop.f32.mrf.mxu1 }
 0x11d   :  { %v164_v61 = vadd.f32 %v595_v13, %v163_v0  ;;  %v242_v0 = vld [vmem:[%s1024_s4 + $0x78] sm:$0xff] }
 0x11e   :  { %312 = vmatpush.msrb.mxu3 %v242_v0 }
 0x124   :  { %v166_v2 = vpop.f32.mrf.mxu1 }
 0x125   :  { %v167_v59 = vadd.f32 %v595_v13, %v166_v2  ;;  %v241_v2 = vld [vmem:[%s1024_s4 + $0x70] sm:$0xff] }
 0x126   :  { %313 = vmatpush.msrb.mxu3 %v241_v2 }
 0x127   :  { %v212_v63 = vmax.f32 %v167_v59, 0.0 }
 0x128   :  { %v187_v1 = vpop.f32.mrf.mxu3 }
 0x129   :  { %v188_v43 = vadd.f32 %v595_v13, %v187_v1  ;;  %v211_v1 = vmax.f32 %v164_v61, 0.0 }
 0x12b   :  { %v219_v49 = vmax.f32 %v188_v43, 0.0 }
 0x12c   :  { %v169_v5 = vpop.f32.mrf.mxu1 }
 0x12d   :  { %v170_v57 = vadd.f32 %v595_v13, %v169_v5  ;;  %v238_v5 = vld [vmem:[%s1024_s4 + $0x58] sm:$0xff] }
 0x12f   :  { %v213_v62 = vmax.f32 %v170_v57, 0.0 }
 0x130   :  { %v190_v3 = vpop.f32.mrf.mxu3 }
 0x131   :  { %v191_v41 = vadd.f32 %v595_v13, %v190_v3  ;;  %v240_v3 = vld [vmem:[%s1024_s4 + $0x68] sm:$0xff] }
 0x132   :  { %314 = vmatpush.msrb.mxu3 %v240_v3 }
 0x133   :  { %v220_v48 = vmax.f32 %v191_v41, 0.0 }
 0x134   :  { %v172_v7 = vpop.f32.mrf.mxu1 }
 0x135   :  { %v173_v55 = vadd.f32 %v595_v13, %v172_v7  ;;  %v236_v7 = vld [vmem:[%s1024_s4 + $0x48] sm:$0xff] }
 0x137   :  { %v214_v60 = vmax.f32 %v173_v55, 0.0 }
 0x138   :  { %v193_v4 = vpop.f32.mrf.mxu3 }
 0x139   :  { %v194_v36 = vadd.f32 %v595_v13, %v193_v4  ;;  %v239_v4 = vld [vmem:[%s1024_s4 + $0x60] sm:$0xff] }
 0x13a   :  { %315 = vmatpush.msrb.mxu3 %v239_v4 }
 0x13b   :  { %v221_v44 = vmax.f32 %v194_v36, 0.0 }
 0x13c   :  { %v175_v9 = vpop.f32.mrf.mxu1  ;;  %316 = vmatpush.msrb.mxu3 %v238_v5 }
 0x13d   :  { %v176_v53 = vadd.f32 %v595_v13, %v175_v9  ;;  %v234_v9 = vld [vmem:[%s1024_s4 + $0x38] sm:$0xff] }
 0x13f   :  { %v215_v58 = vmax.f32 %v176_v53, 0.0 }
 0x140   :  { %v196_v6 = vpop.f32.mrf.mxu3 }
 0x141   :  { %v197_v32 = vadd.f32 %v595_v13, %v196_v6  ;;  %v237_v6 = vld [vmem:[%s1024_s4 + $0x50] sm:$0xff] }
 0x142   :  { %317 = vmatpush.msrb.mxu3 %v237_v6 }
 0x143   :  { %v222_v42 = vmax.f32 %v197_v32, 0.0 }
 0x144   :  { %v178_v11 = vpop.f32.mrf.mxu1  ;;  %318 = vmatpush.msrb.mxu3 %v236_v7 }
 0x145   :  { %v179_v52 = vadd.f32 %v595_v13, %v178_v11  ;;  %v232_v11 = vld [vmem:[%s1024_s4 + $0x28] sm:$0xff] }
 0x147   :  { %v216_v56 = vmax.f32 %v179_v52, 0.0 }
 0x148   :  { %v199_v8 = vpop.f32.mrf.mxu3 }
 0x149   :  { %v200_v30 = vadd.f32 %v595_v13, %v199_v8  ;;  %v235_v8 = vld [vmem:[%s1024_s4 + $0x40] sm:$0xff] }
 0x14a   :  { %319 = vmatpush.msrb.mxu3 %v235_v8 }
 0x14b   :  { %v223_v37 = vmax.f32 %v200_v30, 0.0 }
 0x14c   :  { %v181_v15 = vpop.f32.mrf.mxu1  ;;  %320 = vmatpush.msrb.mxu3 %v234_v9 }
 0x14d   :  { %v182_v50 = vadd.f32 %v595_v13, %v181_v15  ;;  %v228_v15 = vld [vmem:[%s1024_s4 + $0x8] sm:$0xff] }
 0x14f   :  { %v217_v54 = vmax.f32 %v182_v50, 0.0 }
 0x150   :  { %v202_v10 = vpop.f32.mrf.mxu3 }
 0x151   :  { %v203_v26 = vadd.f32 %v595_v13, %v202_v10  ;;  %v233_v10 = vld [vmem:[%s1024_s4 + $0x30] sm:$0xff] }
 0x152   :  { %321 = vmatpush.msrb.mxu3 %v233_v10 }
 0x153   :  { %v224_v35 = vmax.f32 %v203_v26, 0.0 }
 0x154   :  { %v184_v38 = vpop.f32.mrf.mxu1  ;;  %322 = vmatpush.msrb.mxu3 %v232_v11 }
 0x155   :  { %v185_v47 = vadd.f32 %v595_v13, %v184_v38 }
 0x157   :  { %v218_v51 = vmax.f32 %v185_v47, 0.0 }
 0x158   :  { %v205_v12 = vpop.f32.mrf.mxu3 }
 0x159   :  { %v206_v24 = vadd.f32 %v595_v13, %v205_v12  ;;  %v231_v12 = vld [vmem:[%s1024_s4 + $0x20] sm:$0xff] }
 0x15a   :  { %323 = vmatpush.msrb.mxu3 %v231_v12 }
 0x15b   :  { %v225_v31 = vmax.f32 %v206_v24, 0.0  ;;  %v227_v24 = vld [vmem:[%s1024_s4] sm:$0xff] }
 0x160   :  { %v208_v14 = vpop.f32.mrf.mxu3 }
 0x161   :  { %v209_v25 = vadd.f32 %v595_v13, %v208_v14  ;;  %v230_v13 = vld [vmem:[%s1024_s4 + $0x18] sm:$0xff]  ;;  %v229_v14 = vld [vmem:[%s1024_s4 + $0x10] sm:$0xff] }
 0x162   :  { %324 = vmatpush.msrb.mxu3 %v230_v13 }
 0x163   :  { %v226_v29 = vmax.f32 %v209_v25, 0.0 }
 0x164   :  { %325 = vmatpush.msrb.mxu3 %v229_v14 }
 0x165   :  { %244 = vmatpush.msrb.mxu2 %v226_v29 }
 0x166   :  { %326 = vmatpush.msrb.mxu3 %v228_v15 }
 0x167   :  { %245 = vmatpush.msrb.mxu2 %v225_v31 }
 0x168   :  { %327 = vmatpush.msrb.mxu3 %v227_v24 }
 0x169   :  { %246 = vmatpush.msrb.mxu2 %v224_v35 }
 0x16b   :  { %247 = vmatpush.msrb.mxu2 %v223_v37 }
 0x16d   :  { %248 = vmatpush.msrb.mxu2 %v222_v42 }
 0x16f   :  { %249 = vmatpush.msrb.mxu2 %v221_v44 }
 0x171   :  { %250 = vmatpush.msrb.mxu2 %v220_v48 }
 0x173   :  { %251 = vmatpush.msrb.mxu2 %v219_v49 }
 0x175   :  { %252 = vmatpush.msrb.mxu2 %v218_v51 }
 0x177   :  { %253 = vmatpush.msrb.mxu2 %v217_v54 }
 0x179   :  { %254 = vmatpush.msrb.mxu2 %v216_v56 }
 0x17b   :  { %255 = vmatpush.msrb.mxu2 %v215_v58 }
 0x17d   :  { %256 = vmatpush.msrb.mxu2 %v214_v60 }
 0x17f   :  { %257 = vmatpush.msrb.mxu2 %v213_v62 }
 0x181   :  { %258 = vmatpush.msrb.mxu2 %v212_v63 }
 0x183   :  { %259 = vmatpush.msrb.mxu2 %v211_v1  ;;  %v596_v1 = vld [vmem:[%s1025_s5] ss:$0 sm:$0xff] }
 0x184   :  { %260 = vmatmul.f32.vlgmr.msrb.gmra.mxu2 %v699_v17 }
 0x18c   :  { %263 = vmatmul.f32.gmra.mxu2 %v711_v19 }
 0x194   :  { %266 = vmatmul.f32.gmra.mxu2 %v723_v21 }
 0x19c   :  { %269 = vmatmul.f32.gmra.mxu2 %v735_v23 }
 0x1a4   :  { %272 = vmatmul.f32.gmra.mxu2 %v756_v28 }
 0x1ac   :  { %275 = vmatmul.f32.gmra.mxu2 %v780_v34 }
 0x1b4   :  { %278 = vmatmul.f32.gmra.mxu2 %v804_v40 }
 0x1bc   :  { %281 = vmatmul.f32.gmra.mxu2 %v828_v46 }
 0x1c4   :  { %284 = vmatmul.f32.gmra.mxu2 %v694_v16 }
 0x1cc   :  { %287 = vmatmul.f32.gmra.mxu2 %v706_v18 }
 0x1d4   :  { %290 = vmatmul.f32.gmra.mxu2 %v718_v20 }
 0x1dc   :  { %293 = vmatmul.f32.gmra.mxu2 %v730_v22 }
 0x1e4   :  { %296 = vmatmul.f32.gmra.mxu2 %v751_v27 }
 0x1ec   :  { %299 = vmatmul.f32.gmra.mxu2 %v775_v33 }
 0x1f4   :  { %302 = vmatmul.f32.gmra.mxu2 %v799_v39 }
 0x1fc   :  { %305 = vmatmul.f32.gmra.mxu2 %v823_v45 }
 0x207   :  { %v261_v25 = vpop.f32.mrf.mxu2 }
 0x208   :  { %328 = vmatmul.f32.vlgmr.msrb.gmra.mxu3 %v261_v25 }
 0x20f   :  { %v264_v26 = vpop.f32.mrf.mxu2 }
 0x210   :  { %331 = vmatmul.f32.gmra.mxu3 %v264_v26 }
 0x217   :  { %v267_v29 = vpop.f32.mrf.mxu2 }
 0x218   :  { %334 = vmatmul.f32.gmra.mxu3 %v267_v29 }
 0x21f   :  { %v270_v30 = vpop.f32.mrf.mxu2 }
 0x220   :  { %337 = vmatmul.f32.gmra.mxu3 %v270_v30 }
 0x227   :  { %v273_v31 = vpop.f32.mrf.mxu2 }
 0x228   :  { %340 = vmatmul.f32.gmra.mxu3 %v273_v31 }
 0x22f   :  { %v276_v32 = vpop.f32.mrf.mxu2 }
 0x230   :  { %343 = vmatmul.f32.gmra.mxu3 %v276_v32 }
 0x237   :  { %v279_v35 = vpop.f32.mrf.mxu2 }
 0x238   :  { %346 = vmatmul.f32.gmra.mxu3 %v279_v35 }
 0x23f   :  { %v282_v36 = vpop.f32.mrf.mxu2 }
 0x240   :  { %349 = vmatmul.f32.gmra.mxu3 %v282_v36 }
 0x247   :  { %v285_v37 = vpop.f32.mrf.mxu2 }
 0x248   :  { %352 = vmatmul.f32.gmra.mxu3 %v285_v37 }
 0x24f   :  { %v288_v38 = vpop.f32.mrf.mxu2 }
 0x250   :  { %355 = vmatmul.f32.gmra.mxu3 %v288_v38 }
 0x257   :  { %v291_v41 = vpop.f32.mrf.mxu2 }
 0x258   :  { %358 = vmatmul.f32.gmra.mxu3 %v291_v41 }
 0x25f   :  { %v294_v42 = vpop.f32.mrf.mxu2 }
 0x260   :  { %361 = vmatmul.f32.gmra.mxu3 %v294_v42 }
 0x267   :  { %v297_v43 = vpop.f32.mrf.mxu2 }
 0x268   :  { %364 = vmatmul.f32.gmra.mxu3 %v297_v43 }
 0x26f   :  { %v300_v44 = vpop.f32.mrf.mxu2 }
 0x270   :  { %367 = vmatmul.f32.gmra.mxu3 %v300_v44 }
 0x277   :  { %v303_v47 = vpop.f32.mrf.mxu2 }
 0x278   :  { %370 = vmatmul.f32.gmra.mxu3 %v303_v47 }
 0x27f   :  { %v306_v48 = vpop.f32.mrf.mxu2 }
 0x280   :  { %373 = vmatmul.f32.gmra.mxu3 %v306_v48 }
 0x28b   :  { %v329_v49 = vpop.f32.mrf.mxu3 }
 0x28c   :  { %v330_v44 = vadd.f32 %v596_v1, %v329_v49  ;;  %v407_v49 = vld [vmem:[%s1026_s6 + $0x70] sm:$0xff] }
 0x293   :  { %v332_v50 = vpop.f32.mrf.mxu3 }
 0x294   :  { %v333_v42 = vadd.f32 %v596_v1, %v332_v50  ;;  %v408_v50 = vld [vmem:[%s1026_s6 + $0x78] sm:$0xff] }
 0x295   :  { %478 = vmatpush.msrb.mxu1 %v408_v50 }
 0x296   :  { %v378_v48 = vmax.f32 %v333_v42, 0.0 }
 0x297   :  { %479 = vmatpush.msrb.mxu1 %v407_v49 }
 0x29b   :  { %v335_v51 = vpop.f32.mrf.mxu3 }
 0x29c   :  { %v336_v38 = vadd.f32 %v596_v1, %v335_v51  ;;  %v399_v51 = vld [vmem:[%s1026_s6 + $0x30] sm:$0xff] }
 0x29e   :  { %v379_v47 = vmax.f32 %v336_v38, 0.0 }
 0x2a3   :  { %v338_v52 = vpop.f32.mrf.mxu3 }
 0x2a4   :  { %v339_v36 = vadd.f32 %v596_v1, %v338_v52  ;;  %v397_v52 = vld [vmem:[%s1026_s6 + $0x20] sm:$0xff] }
 0x2a6   :  { %v380_v43 = vmax.f32 %v339_v36, 0.0 }
 0x2ab   :  { %v341_v53 = vpop.f32.mrf.mxu3 }
 0x2ac   :  { %v342_v32 = vadd.f32 %v596_v1, %v341_v53  ;;  %v395_v53 = vld [vmem:[%s1026_s6 + $0x10] sm:$0xff] }
 0x2ae   :  { %v381_v41 = vmax.f32 %v342_v32, 0.0 }
 0x2b3   :  { %v344_v54 = vpop.f32.mrf.mxu3 }
 0x2b4   :  { %v345_v30 = vadd.f32 %v596_v1, %v344_v54  ;;  %v377_v54 = vmax.f32 %v330_v44, 0.0 }
 0x2b6   :  { %v382_v37 = vmax.f32 %v345_v30, 0.0 }
 0x2bb   :  { %v347_v55 = vpop.f32.mrf.mxu3 }
 0x2bc   :  { %v348_v26 = vadd.f32 %v596_v1, %v347_v55  ;;  %v393_v55 = vld [vmem:[%s1026_s6] sm:$0xff] }
 0x2be   :  { %v383_v35 = vmax.f32 %v348_v26, 0.0 }
 0x2c3   :  { %v350_v56 = vpop.f32.mrf.mxu3 }
 0x2c4   :  { %v351_v24 = vadd.f32 %v596_v1, %v350_v56 }
 0x2c6   :  { %v384_v31 = vmax.f32 %v351_v24, 0.0 }
 0x2cb   :  { %v353_v57 = vpop.f32.mrf.mxu3 }
 0x2cc   :  { %v354_v14 = vadd.f32 %v596_v1, %v353_v57 }
 0x2ce   :  { %v385_v29 = vmax.f32 %v354_v14, 0.0 }
 0x2d3   :  { %v356_v58 = vpop.f32.mrf.mxu3 }
 0x2d4   :  { %v357_v12 = vadd.f32 %v596_v1, %v356_v58 }
 0x2d6   :  { %v386_v25 = vmax.f32 %v357_v12, 0.0 }
 0x2db   :  { %v359_v59 = vpop.f32.mrf.mxu3 }
 0x2dc   :  { %v360_v10 = vadd.f32 %v596_v1, %v359_v59 }
 0x2de   :  { %v387_v15 = vmax.f32 %v360_v10, 0.0 }
 0x2e3   :  { %v362_v60 = vpop.f32.mrf.mxu3 }
 0x2e4   :  { %v363_v8 = vadd.f32 %v596_v1, %v362_v60 }
 0x2e6   :  { %v388_v13 = vmax.f32 %v363_v8, 0.0 }
 0x2eb   :  { %v365_v61 = vpop.f32.mrf.mxu3 }
 0x2ec   :  { %v366_v6 = vadd.f32 %v596_v1, %v365_v61 }
 0x2ee   :  { %v389_v11 = vmax.f32 %v366_v6, 0.0 }
 0x2f3   :  { %v368_v62 = vpop.f32.mrf.mxu3 }
 0x2f4   :  { %v369_v4 = vadd.f32 %v596_v1, %v368_v62 }
 0x2f6   :  { %v390_v9 = vmax.f32 %v369_v4, 0.0 }
 0x2fb   :  { %v371_v63 = vpop.f32.mrf.mxu3 }
 0x2fc   :  { %v372_v2 = vadd.f32 %v596_v1, %v371_v63 }
 0x2fe   :  { %v391_v7 = vmax.f32 %v372_v2, 0.0  ;;  %v597_v2 = vld [vmem:[%s1027_s7] ss:$0 sm:$0xff] }
 0x303   :  { %v374_v0 = vpop.f32.mrf.mxu3 }
 0x304   :  { %v375_v3 = vadd.f32 %v596_v1, %v374_v0 }
 0x306   :  { %v392_v5 = vmax.f32 %v375_v3, 0.0 }
 0x308   :  { %410 = vmatpush.msrb.mxu0 %v392_v5 }
 0x30a   :  { %411 = vmatpush.msrb.mxu0 %v391_v7 }
 0x30c   :  { %412 = vmatpush.msrb.mxu0 %v390_v9 }
 0x30e   :  { %413 = vmatpush.msrb.mxu0 %v389_v11 }
 0x310   :  { %414 = vmatpush.msrb.mxu0 %v388_v13 }
 0x312   :  { %415 = vmatpush.msrb.mxu0 %v387_v15 }
 0x314   :  { %416 = vmatpush.msrb.mxu0 %v386_v25 }
 0x316   :  { %417 = vmatpush.msrb.mxu0 %v385_v29 }
 0x318   :  { %418 = vmatpush.msrb.mxu0 %v384_v31 }
 0x31a   :  { %419 = vmatpush.msrb.mxu0 %v383_v35 }
 0x31c   :  { %420 = vmatpush.msrb.mxu0 %v382_v37 }
 0x31e   :  { %421 = vmatpush.msrb.mxu0 %v381_v41 }
 0x320   :  { %422 = vmatpush.msrb.mxu0 %v380_v43 }
 0x322   :  { %423 = vmatpush.msrb.mxu0 %v379_v47 }
 0x324   :  { %424 = vmatpush.msrb.mxu0 %v378_v48 }
 0x326   :  { %425 = vmatpush.msrb.mxu0 %v377_v54 }
 0x327   :  { %426 = vmatmul.f32.vlgmr.msrb.gmra.mxu0 %v699_v17  ;;  %v406_v17 = vld [vmem:[%s1026_s6 + $0x68] sm:$0xff] }
 0x328   :  { %480 = vmatpush.msrb.mxu1 %v406_v17 }
 0x32f   :  { %429 = vmatmul.f32.gmra.mxu0 %v711_v19  ;;  %v405_v19 = vld [vmem:[%s1026_s6 + $0x60] sm:$0xff] }
 0x330   :  { %481 = vmatpush.msrb.mxu1 %v405_v19 }
 0x337   :  { %432 = vmatmul.f32.gmra.mxu0 %v723_v21  ;;  %v404_v21 = vld [vmem:[%s1026_s6 + $0x58] sm:$0xff] }
 0x338   :  { %482 = vmatpush.msrb.mxu1 %v404_v21 }
 0x33f   :  { %435 = vmatmul.f32.gmra.mxu0 %v735_v23  ;;  %v403_v23 = vld [vmem:[%s1026_s6 + $0x50] sm:$0xff] }
 0x340   :  { %483 = vmatpush.msrb.mxu1 %v403_v23 }
 0x347   :  { %438 = vmatmul.f32.gmra.mxu0 %v756_v28  ;;  %v402_v28 = vld [vmem:[%s1026_s6 + $0x48] sm:$0xff] }
 0x348   :  { %484 = vmatpush.msrb.mxu1 %v402_v28 }
 0x34f   :  { %441 = vmatmul.f32.gmra.mxu0 %v780_v34  ;;  %v401_v34 = vld [vmem:[%s1026_s6 + $0x40] sm:$0xff] }
 0x350   :  { %485 = vmatpush.msrb.mxu1 %v401_v34 }
 0x357   :  { %444 = vmatmul.f32.gmra.mxu0 %v804_v40  ;;  %v400_v40 = vld [vmem:[%s1026_s6 + $0x38] sm:$0xff] }
 0x358   :  { %486 = vmatpush.msrb.mxu1 %v400_v40 }
 0x35a   :  { %487 = vmatpush.msrb.mxu1 %v399_v51 }
 0x35f   :  { %447 = vmatmul.f32.gmra.mxu0 %v828_v46  ;;  %v398_v46 = vld [vmem:[%s1026_s6 + $0x28] sm:$0xff] }
 0x360   :  { %488 = vmatpush.msrb.mxu1 %v398_v46 }
 0x362   :  { %489 = vmatpush.msrb.mxu1 %v397_v52 }
 0x367   :  { %450 = vmatmul.f32.gmra.mxu0 %v694_v16  ;;  %v396_v16 = vld [vmem:[%s1026_s6 + $0x18] sm:$0xff] }
 0x368   :  { %490 = vmatpush.msrb.mxu1 %v396_v16 }
 0x36a   :  { %491 = vmatpush.msrb.mxu1 %v395_v53 }
 0x36f   :  { %453 = vmatmul.f32.gmra.mxu0 %v706_v18  ;;  %v394_v18 = vld [vmem:[%s1026_s6 + $0x8] sm:$0xff] }
 0x370   :  { %492 = vmatpush.msrb.mxu1 %v394_v18 }
 0x372   :  { %493 = vmatpush.msrb.mxu1 %v393_v55 }
 0x377   :  { %456 = vmatmul.f32.gmra.mxu0 %v718_v20 }
 0x37f   :  { %459 = vmatmul.f32.gmra.mxu0 %v730_v22 }
 0x387   :  { %462 = vmatmul.f32.gmra.mxu0 %v751_v27 }
 0x38f   :  { %465 = vmatmul.f32.gmra.mxu0 %v775_v33 }
 0x397   :  { %468 = vmatmul.f32.gmra.mxu0 %v799_v39 }
 0x39f   :  { %471 = vmatmul.f32.gmra.mxu0 %v823_v45 }
 0x3a4   :  { %v427_v20 = vpop.f32.mrf.mxu0 }
 0x3a5   :  { %494 = vmatmul.f32.vlgmr.msrb.gmra.mxu1 %v427_v20 }
 0x3ac   :  { %v430_v56 = vpop.f32.mrf.mxu0 }
 0x3ad   :  { %497 = vmatmul.f32.gmra.mxu1 %v430_v56 }
 0x3b4   :  { %v433_v57 = vpop.f32.mrf.mxu0 }
 0x3b5   :  { %500 = vmatmul.f32.gmra.mxu1 %v433_v57 }
 0x3bc   :  { %v436_v22 = vpop.f32.mrf.mxu0 }
 0x3bd   :  { %503 = vmatmul.f32.gmra.mxu1 %v436_v22 }
 0x3c4   :  { %v439_v58 = vpop.f32.mrf.mxu0 }
 0x3c5   :  { %506 = vmatmul.f32.gmra.mxu1 %v439_v58 }
 0x3cc   :  { %v442_v59 = vpop.f32.mrf.mxu0 }
 0x3cd   :  { %509 = vmatmul.f32.gmra.mxu1 %v442_v59 }
 0x3d4   :  { %v445_v60 = vpop.f32.mrf.mxu0 }
 0x3d5   :  { %512 = vmatmul.f32.gmra.mxu1 %v445_v60 }
 0x3dc   :  { %v448_v27 = vpop.f32.mrf.mxu0 }
 0x3dd   :  { %515 = vmatmul.f32.gmra.mxu1 %v448_v27 }
 0x3e4   :  { %v451_v33 = vpop.f32.mrf.mxu0 }
 0x3e5   :  { %518 = vmatmul.f32.gmra.mxu1 %v451_v33 }
 0x3ec   :  { %v454_v39 = vpop.f32.mrf.mxu0 }
 0x3ed   :  { %521 = vmatmul.f32.gmra.mxu1 %v454_v39 }
 0x3f4   :  { %v457_v45 = vpop.f32.mrf.mxu0 }
 0x3f5   :  { %524 = vmatmul.f32.gmra.mxu1 %v457_v45 }
 0x3fc   :  { %v460_v61 = vpop.f32.mrf.mxu0 }
 0x3fd   :  { %527 = vmatmul.f32.gmra.mxu1 %v460_v61 }
 0x404   :  { %v463_v62 = vpop.f32.mrf.mxu0 }
 0x405   :  { %530 = vmatmul.f32.gmra.mxu1 %v463_v62 }
 0x40c   :  { %v466_v63 = vpop.f32.mrf.mxu0 }
 0x40d   :  { %533 = vmatmul.f32.gmra.mxu1 %v466_v63 }
 0x414   :  { %v469_v1 = vpop.f32.mrf.mxu0 }
 0x415   :  { %536 = vmatmul.f32.gmra.mxu1 %v469_v1 }
 0x41c   :  { %v472_v0 = vpop.f32.mrf.mxu0 }
 0x41d   :  { %539 = vmatmul.f32.gmra.mxu1 %v472_v0 }
 0x422   :  { %v495_v3 = vpop.f32.mrf.mxu1 }
 0x423   :  { %v496_v4 = vadd.f32 %v597_v2, %v495_v3 }
 0x425   :  { %543 = vst [vmem:[%s1028_s8] sm:$0xff] %v496_v4 }
 0x42a   :  { %v498_v5 = vpop.f32.mrf.mxu1 }
 0x42b   :  { %v499_v6 = vadd.f32 %v597_v2, %v498_v5 }
 0x42d   :  { %544 = vst [vmem:[%s1028_s8 + $0x8] sm:$0xff] %v499_v6 }
 0x432   :  { %v501_v7 = vpop.f32.mrf.mxu1 }
 0x433   :  { %v502_v8 = vadd.f32 %v597_v2, %v501_v7 }
 0x435   :  { %545 = vst [vmem:[%s1028_s8 + $0x10] sm:$0xff] %v502_v8 }
 0x43a   :  { %v504_v9 = vpop.f32.mrf.mxu1 }
 0x43b   :  { %v505_v10 = vadd.f32 %v597_v2, %v504_v9 }
 0x43d   :  { %546 = vst [vmem:[%s1028_s8 + $0x18] sm:$0xff] %v505_v10 }
 0x442   :  { %v507_v11 = vpop.f32.mrf.mxu1 }
 0x443   :  { %v508_v12 = vadd.f32 %v597_v2, %v507_v11 }
 0x445   :  { %547 = vst [vmem:[%s1028_s8 + $0x20] sm:$0xff] %v508_v12 }
 0x44a   :  { %v510_v13 = vpop.f32.mrf.mxu1 }
 0x44b   :  { %v511_v14 = vadd.f32 %v597_v2, %v510_v13 }
 0x44d   :  { %548 = vst [vmem:[%s1028_s8 + $0x28] sm:$0xff] %v511_v14 }
 0x452   :  { %v513_v15 = vpop.f32.mrf.mxu1 }
 0x453   :  { %v514_v24 = vadd.f32 %v597_v2, %v513_v15 }
 0x455   :  { %549 = vst [vmem:[%s1028_s8 + $0x30] sm:$0xff] %v514_v24 }
 0x45a   :  { %v516_v25 = vpop.f32.mrf.mxu1 }
 0x45b   :  { %v517_v26 = vadd.f32 %v597_v2, %v516_v25 }
 0x45d   :  { %550 = vst [vmem:[%s1028_s8 + $0x38] sm:$0xff] %v517_v26 }
 0x462   :  { %v519_v29 = vpop.f32.mrf.mxu1 }
 0x463   :  { %v520_v30 = vadd.f32 %v597_v2, %v519_v29 }
 0x465   :  { %551 = vst [vmem:[%s1028_s8 + $0x40] sm:$0xff] %v520_v30 }
 0x46a   :  { %v522_v31 = vpop.f32.mrf.mxu1 }
 0x46b   :  { %v523_v32 = vadd.f32 %v597_v2, %v522_v31 }
 0x46d   :  { %552 = vst [vmem:[%s1028_s8 + $0x48] sm:$0xff] %v523_v32 }
 0x472   :  { %v525_v35 = vpop.f32.mrf.mxu1 }
 0x473   :  { %v526_v36 = vadd.f32 %v597_v2, %v525_v35 }
 0x475   :  { %553 = vst [vmem:[%s1028_s8 + $0x50] sm:$0xff] %v526_v36 }
 0x47a   :  { %v528_v37 = vpop.f32.mrf.mxu1 }
 0x47b   :  { %v529_v38 = vadd.f32 %v597_v2, %v528_v37 }
 0x47d   :  { %554 = vst [vmem:[%s1028_s8 + $0x58] sm:$0xff] %v529_v38 }
 0x482   :  { %v531_v41 = vpop.f32.mrf.mxu1 }
 0x483   :  { %v532_v42 = vadd.f32 %v597_v2, %v531_v41 }
 0x485   :  { %555 = vst [vmem:[%s1028_s8 + $0x60] sm:$0xff] %v532_v42 }
 0x48a   :  { %v534_v43 = vpop.f32.mrf.mxu1 }
 0x48b   :  { %v535_v44 = vadd.f32 %v597_v2, %v534_v43 }
 0x48d   :  { %556 = vst [vmem:[%s1028_s8 + $0x68] sm:$0xff] %v535_v44 }
 0x492   :  { %v537_v47 = vpop.f32.mrf.mxu1 }
 0x493   :  { %v538_v48 = vadd.f32 %v597_v2, %v537_v47 }
 0x495   :  { %557 = vst [vmem:[%s1028_s8 + $0x70] sm:$0xff] %v538_v48 }
 0x49a   :  { %v540_v54 = vpop.f32.mrf.mxu1 }
 0x49b   :  { %v541_v50 = vadd.f32 %v597_v2, %v540_v54 }
 0x49d   :  { %558 = vst [vmem:[%s1028_s8 + $0x78] sm:$0xff] %v541_v50 }

</bundles_post_ra>
